<compile_context>
chip_gen: v7x
topology: tpu7x:2x2x1
jax: 0.10.0
libtpu: 0.0.40
codegen_flags: <defaults>
</compile_context>

<pallas_src>
import functools

import jax
import jax.numpy as jnp
from jax.experimental import pallas as pl
from jax.experimental.pallas import tpu as pltpu


def _round_up(x, m):
    return ((x + m - 1) // m) * m


# Per-element double-buffered VMEM traffic: 4 B depth in + 12 B xyz out, x2 buffers.
_BYTES_PER_ELEM_PIPELINED = 32
# Block budget: large enough to run HBM near roofline, small enough for every
# generation (v5e 16 MiB scoped default, v7x 64 MiB physical).
_VMEM_BLOCK_BUDGET_BYTES = 12 * 1024 * 1024


def _choose_row_tiling(h, w_pad):
    """Pick (h_tile, h_pad): h_tile is a multiple of 8 sized to the VMEM budget.

    H is padded *up to the chosen tile* (never falls back to tiny 8-row tiles),
    and when several tiles are needed the tile is chosen to minimize padding.
    """
    h8 = _round_up(h, 8)
    max_rows = max(
        8, ((_VMEM_BLOCK_BUDGET_BYTES // _BYTES_PER_ELEM_PIPELINED) // w_pad) // 8 * 8
    )
    if h8 <= max_rows:
        h_tile = h8
    else:
        n_tiles = pl.cdiv(h8, max_rows)
        h_tile = _round_up(pl.cdiv(h8, n_tiles), 8)
    h_pad = _round_up(h, h_tile)
    return h_tile, h_pad


def _d_to_cloud_kernel(h_tile, w_pad, invk_ref, depth_ref, out_ref):
    # invk_ref : SMEM (B, 9) f32  [k00,k01,k02,k10,...,k22]  (scalar-prefetched)
    # depth_ref: VMEM (1, H_TILE, W_PAD) f32
    # out_ref  : VMEM (1, 3, H_TILE, W_PAD) f32
    b = pl.program_id(0)
    t = pl.program_id(1)

    d = depth_ref[0]                                                     # (H_TILE, W_PAD)

    # Separable pixel coordinates (generated in-kernel, no pix tensor in HBM):
    #   u = column index -> depends only on the lane,   shape (1, W_PAD)
    #   v = global row index -> depends only on the row, shape (H_TILE, 1)
    u_row = jax.lax.broadcasted_iota(jnp.int32, (1, w_pad), 1).astype(jnp.float32)
    v_col = (
        jax.lax.broadcasted_iota(jnp.int32, (h_tile, 1), 0) + t * h_tile
    ).astype(jnp.float32)

    k00 = invk_ref[b, 0]; k01 = invk_ref[b, 1]; k02 = invk_ref[b, 2]
    k10 = invk_ref[b, 3]; k11 = invk_ref[b, 4]; k12 = invk_ref[b, 5]
    k20 = invk_ref[b, 6]; k21 = invk_ref[b, 7]; k22 = invk_ref[b, 8]

    # Per-plane: tiny per-row / per-column terms, then ~2 VALU ops per element
    # (broadcast add + multiply) and a wide unmasked lane-dense store.
    out_ref[0, 0] = ((k00 * u_row + k02) + k01 * v_col) * d
    out_ref[0, 1] = ((k10 * u_row + k12) + k11 * v_col) * d
    out_ref[0, 2] = ((k20 * u_row + k22) + k21 * v_col) * d


def d_to_cloud(depth, inv_K, *, batch_size, height, width):
    """depth: (B, 1, H, W), inv_K: (B, 4, 4) (only [:3,:3] used).

    Returns (B, H*W, 3) float32, matching the PyTorch forward.
    """
    B, H, W = batch_size, height, width
    HW = H * W

    w_pad = _round_up(W, 128)
    h_tile, h_pad = _choose_row_tiling(H, w_pad)
    n_h_tiles = h_pad // h_tile
    needs_pad = (h_pad, w_pad) != (H, W)

    # ---- glue (plain JAX): lane-dense depth plane + flat inv_K scalars ----
    depth_p = depth.reshape(B, H, W)
    if depth_p.dtype != jnp.float32:
        depth_p = depth_p.astype(jnp.float32)
    if needs_pad:  # skipped entirely on aligned shapes (no extra HBM pass)
        depth_p = jnp.pad(depth_p, ((0, 0), (0, h_pad - H), (0, w_pad - W)))
    invk_flat = inv_K[:, :3, :3].reshape(B, 9).astype(jnp.float32)

    kernel = functools.partial(_d_to_cloud_kernel, h_tile, w_pad)

    elems = B * h_pad * w_pad
    out = pl.pallas_call(
        kernel,
        out_shape=jax.ShapeDtypeStruct((B, 3, h_pad, w_pad), jnp.float32),
        grid_spec=pltpu.PrefetchScalarGridSpec(
            num_scalar_prefetch=1,                       # inv_K scalars -> SMEM
            grid=(B, n_h_tiles),
            in_specs=[
                pl.BlockSpec((1, h_tile, w_pad), lambda b, t, invk: (b, t, 0)),
            ],
            out_specs=pl.BlockSpec(
                (1, 3, h_tile, w_pad), lambda b, t, invk: (b, 0, t, 0)
            ),
        ),
        compiler_params=pltpu.CompilerParams(
            dimension_semantics=("parallel", "parallel"),
            vmem_limit_bytes=32 * 1024 * 1024,
        ),
        cost_estimate=pl.CostEstimate(
            flops=6 * elems, transcendentals=0, bytes_accessed=16 * elems
        ),
    )(invk_flat, depth_p)

    # ---- glue: un-pad (no-op on aligned shapes) + the module's (0,2,1) permute ----
    if needs_pad:
        out = out[:, :, :H, :W]
    out = out.reshape(B, 3, HW)
    # TODO(synk): if the downstream consumer can take planar (B, 3, HW) (the better
    # operand layout for a following 3x3/4x4 transform), return `out` here and drop
    # this lane-hostile transpose pass.
    return jnp.transpose(out, (0, 2, 1))                 # (B, HW, 3)


if __name__ == "__main__":
    B, H, W = 2, 16, 16
    key = jax.random.PRNGKey(0)
    k_depth, k_invk = jax.random.split(key)

    depth = jax.random.uniform(k_depth, (B, 1, H, W), dtype=jnp.float32) * 10.0 + 0.1
    # Synthetic inverse-intrinsics-like 4x4 matrices (deterministic).
    inv_K = (
        jnp.broadcast_to(jnp.eye(4, dtype=jnp.float32), (B, 4, 4))
        + 0.01 * jax.random.normal(k_invk, (B, 4, 4), dtype=jnp.float32)
    )

    out = jax.block_until_ready(
        d_to_cloud(depth, inv_K, batch_size=B, height=H, width=W)
    )

    # Pure-JAX reference of the PyTorch forward (np.meshgrid indexing='xy').
    xs, ys = jnp.meshgrid(
        jnp.arange(W, dtype=jnp.float32),
        jnp.arange(H, dtype=jnp.float32),
        indexing="xy",
    )
    pix = jnp.stack(
        [xs.reshape(-1), ys.reshape(-1), jnp.ones((H * W,), jnp.float32)], axis=0
    )                                                     # (3, HW)
    pix = jnp.broadcast_to(pix[None], (B, 3, H * W))
    cam_ref = jnp.einsum("bij,bjn->bin", inv_K[:, :3, :3], pix)
    cam_ref = depth.reshape(B, 1, -1) * cam_ref
    cam_ref = jnp.transpose(cam_ref, (0, 2, 1))           # (B, HW, 3)

    assert out.shape == (B, H * W, 3)
    assert jnp.allclose(out, cam_ref, atol=1e-4, rtol=1e-4)
    print("KERNEL_OK")
</pallas_src>

<mosaic_0001>
module attributes {stable_mosaic.version = 11 : i64} {
  func.func @_d_to_cloud_kernel(%arg0: i32, %arg1: i32, %arg2: memref<2x9xf32, #tpu.memory_space<smem>>, %arg3: memref<1x16x128xf32, #tpu.memory_space<vmem>>, %arg4: memref<1x3x16x128xf32, #tpu.memory_space<vmem>>) attributes {dimension_semantics = [#tpu.dimension_semantics<parallel>, #tpu.dimension_semantics<parallel>], iteration_bounds = array<i64: 2, 1>, scalar_prefetch = 1 : i64, scratch_operands = 0 : i64, tpu.core_type = #tpu.core_type<tc>, window_params = [{transform_indices = @transform_0, window_bounds = array<i64: 1, 16, 128>}, {transform_indices = @transform_1, window_bounds = array<i64: 1, 3, 16, 128>}]} {
    %c0 = arith.constant 0 : index
    %c0_0 = arith.constant 0 : index
    %c0_1 = arith.constant 0 : index
    %0 = vector.load %arg3[%c0, %c0_0, %c0_1] : memref<1x16x128xf32, #tpu.memory_space<vmem>>, vector<1x16x128xf32>
    %1 = vector.shape_cast %0 : vector<1x16x128xf32> to vector<16x128xf32>
    %2 = tpu.iota {dimensions = array<i32: 1>} : vector<1x128xi32>
    %3 = arith.sitofp %2 : vector<1x128xi32> to vector<1x128xf32>
    %4 = tpu.iota {dimensions = array<i32: 0>} : vector<16x1xi32>
    %c16_i32 = arith.constant 16 : i32
    %5 = arith.muli %arg1, %c16_i32 : i32
    %6 = vector.broadcast %5 : i32 to vector<16x1xi32>
    %7 = arith.addi %4, %6 : vector<16x1xi32>
    %8 = arith.sitofp %7 : vector<16x1xi32> to vector<16x1xf32>
    %9 = arith.index_cast %arg0 : i32 to index
    %c0_2 = arith.constant 0 : index
    %10 = memref.load %arg2[%9, %c0_2] : memref<2x9xf32, #tpu.memory_space<smem>>
    %11 = arith.index_cast %arg0 : i32 to index
    %c1 = arith.constant 1 : index
    %12 = memref.load %arg2[%11, %c1] : memref<2x9xf32, #tpu.memory_space<smem>>
    %13 = arith.index_cast %arg0 : i32 to index
    %c2 = arith.constant 2 : index
    %14 = memref.load %arg2[%13, %c2] : memref<2x9xf32, #tpu.memory_space<smem>>
    %15 = arith.index_cast %arg0 : i32 to index
    %c3 = arith.constant 3 : index
    %16 = memref.load %arg2[%15, %c3] : memref<2x9xf32, #tpu.memory_space<smem>>
    %17 = arith.index_cast %arg0 : i32 to index
    %c4 = arith.constant 4 : index
    %18 = memref.load %arg2[%17, %c4] : memref<2x9xf32, #tpu.memory_space<smem>>
    %19 = arith.index_cast %arg0 : i32 to index
    %c5 = arith.constant 5 : index
    %20 = memref.load %arg2[%19, %c5] : memref<2x9xf32, #tpu.memory_space<smem>>
    %21 = arith.index_cast %arg0 : i32 to index
    %c6 = arith.constant 6 : index
    %22 = memref.load %arg2[%21, %c6] : memref<2x9xf32, #tpu.memory_space<smem>>
    %23 = arith.index_cast %arg0 : i32 to index
    %c7 = arith.constant 7 : index
    %24 = memref.load %arg2[%23, %c7] : memref<2x9xf32, #tpu.memory_space<smem>>
    %25 = arith.index_cast %arg0 : i32 to index
    %c8 = arith.constant 8 : index
    %26 = memref.load %arg2[%25, %c8] : memref<2x9xf32, #tpu.memory_space<smem>>
    %27 = vector.broadcast %10 : f32 to vector<1x128xf32>
    %28 = arith.mulf %27, %3 : vector<1x128xf32>
    %29 = vector.broadcast %14 : f32 to vector<1x128xf32>
    %30 = arith.addf %28, %29 : vector<1x128xf32>
    %31 = vector.broadcast %12 : f32 to vector<16x1xf32>
    %32 = arith.mulf %31, %8 : vector<16x1xf32>
    %33 = vector.broadcast %30 : vector<1x128xf32> to vector<16x128xf32>
    %34 = vector.broadcast %32 : vector<16x1xf32> to vector<16x128xf32>
    %35 = arith.addf %33, %34 : vector<16x128xf32>
    %36 = arith.mulf %35, %1 : vector<16x128xf32>
    %c0_3 = arith.constant 0 : index
    %c0_4 = arith.constant 0 : index
    %c0_5 = arith.constant 0 : index
    %c0_6 = arith.constant 0 : index
    %37 = vector.load %arg4[%c0_3, %c0_4, %c0_5, %c0_6] : memref<1x3x16x128xf32, #tpu.memory_space<vmem>>, vector<1x1x16x128xf32>
    %38 = vector.shape_cast %37 : vector<1x1x16x128xf32> to vector<16x128xf32>
    %39 = vector.shape_cast %36 : vector<16x128xf32> to vector<1x1x16x128xf32>
    tpu.vector_store %arg4[%c0_3, %c0_4, %c0_5, %c0_6], %39 {strides = array<i32>} : memref<1x3x16x128xf32, #tpu.memory_space<vmem>>, vector<1x1x16x128xf32>,
    %40 = vector.broadcast %16 : f32 to vector<1x128xf32>
    %41 = arith.mulf %40, %3 : vector<1x128xf32>
    %42 = vector.broadcast %20 : f32 to vector<1x128xf32>
    %43 = arith.addf %41, %42 : vector<1x128xf32>
    %44 = vector.broadcast %18 : f32 to vector<16x1xf32>
    %45 = arith.mulf %44, %8 : vector<16x1xf32>
    %46 = vector.broadcast %43 : vector<1x128xf32> to vector<16x128xf32>
    %47 = vector.broadcast %45 : vector<16x1xf32> to vector<16x128xf32>
    %48 = arith.addf %46, %47 : vector<16x128xf32>
    %49 = arith.mulf %48, %1 : vector<16x128xf32>
    %c0_7 = arith.constant 0 : index
    %c1_8 = arith.constant 1 : index
    %c0_9 = arith.constant 0 : index
    %c0_10 = arith.constant 0 : index
    %50 = vector.load %arg4[%c0_7, %c1_8, %c0_9, %c0_10] : memref<1x3x16x128xf32, #tpu.memory_space<vmem>>, vector<1x1x16x128xf32>
    %51 = vector.shape_cast %50 : vector<1x1x16x128xf32> to vector<16x128xf32>
    %52 = vector.shape_cast %49 : vector<16x128xf32> to vector<1x1x16x128xf32>
    tpu.vector_store %arg4[%c0_7, %c1_8, %c0_9, %c0_10], %52 {strides = array<i32>} : memref<1x3x16x128xf32, #tpu.memory_space<vmem>>, vector<1x1x16x128xf32>,
    %53 = vector.broadcast %22 : f32 to vector<1x128xf32>
    %54 = arith.mulf %53, %3 : vector<1x128xf32>
    %55 = vector.broadcast %26 : f32 to vector<1x128xf32>
    %56 = arith.addf %54, %55 : vector<1x128xf32>
    %57 = vector.broadcast %24 : f32 to vector<16x1xf32>
    %58 = arith.mulf %57, %8 : vector<16x1xf32>
    %59 = vector.broadcast %56 : vector<1x128xf32> to vector<16x128xf32>
    %60 = vector.broadcast %58 : vector<16x1xf32> to vector<16x128xf32>
    %61 = arith.addf %59, %60 : vector<16x128xf32>
    %62 = arith.mulf %61, %1 : vector<16x128xf32>
    %c0_11 = arith.constant 0 : index
    %c2_12 = arith.constant 2 : index
    %c0_13 = arith.constant 0 : index
    %c0_14 = arith.constant 0 : index
    %63 = vector.load %arg4[%c0_11, %c2_12, %c0_13, %c0_14] : memref<1x3x16x128xf32, #tpu.memory_space<vmem>>, vector<1x1x16x128xf32>
    %64 = vector.shape_cast %63 : vector<1x1x16x128xf32> to vector<16x128xf32>
    %65 = vector.shape_cast %62 : vector<16x128xf32> to vector<1x1x16x128xf32>
    tpu.vector_store %arg4[%c0_11, %c2_12, %c0_13, %c0_14], %65 {strides = array<i32>} : memref<1x3x16x128xf32, #tpu.memory_space<vmem>>, vector<1x1x16x128xf32>,
    return
  }
  func.func @transform_0(%arg0: i32, %arg1: i32, %arg2: memref<2x9xf32, #tpu.memory_space<smem>>) -> (i32, i32, i32) {
    %c0_i32 = arith.constant 0 : i32
    %c0_i32_0 = arith.constant 0 : i32
    return %arg0, %arg1, %c0_i32 : i32, i32, i32
  }
  func.func @transform_1(%arg0: i32, %arg1: i32, %arg2: memref<2x9xf32, #tpu.memory_space<smem>>) -> (i32, i32, i32, i32) {
    %c0_i32 = arith.constant 0 : i32
    %c0_i32_0 = arith.constant 0 : i32
    %c0_i32_1 = arith.constant 0 : i32
    return %arg0, %c0_i32, %arg1, %c0_i32_0 : i32, i32, i32, i32
  }
}

</mosaic_0001>

<bundles_post_ra>
// kernel: tpu_custom_call.1
= control target key start
LH: loop header
LB: loop body
LE: loop exit
PB: predicated region body
PF: predicated region fallthrough
CT: control target
= control target key end

     0   :  { %s777_s0 = inlined_call_operand.hbm [shape: f32[2,9], index: 0, kind: input, shape index: {}]   ;;  %s778_s1 = inlined_call_operand.hbm [shape: f32[2,16,128], index: 1, kind: input, shape index: {}]   ;;  %s779_s2 = inlined_call_operand.hbm [shape: f32[2,3,16,128], index: 2, kind: output, shape index: {}]  }
   0x1   :  { %s423_s11 = scalar_lea.hbm %s777_s0, 32 }
   0x2   :  { %p424_p0 = scmp.ne.s32.totalorder %s777_s0, %s423_s11  ;;  %p427_p1 = scmp.lt.u32.totalorder %s423_s11, %s777_s0 }
   0x4   :  { %p429_p2 = pnand %p427_p1, %p424_p0 }
   0x6   :  { %432 = shalt.err (!%p429_p2)  }
   0x7   :  { %s549_s16 = smov [#allocation3]  }
   0x8   :  { %8 = dma.hbm_to_smem %s777_s0, 32, %s549_s16, [#allocation2] }
   0x9   :  { %515 = dma.done.wait [#allocation2], 32 }
   0xa   :  { %516 = vsyncadd [#allocation2], 4294967264 }
   0xb   :  { %10 = sfence }
   0xc   :  { %11 = vsyncpa [#allocation5], 0 }
   0xd   :  { %13 = vsyncpa [#allocation5 + $0x1], 0 }
   0xe   :  { %14 = vsyncpa [#allocation6], 0 }
   0xf   :  { %16 = vsyncpa [#allocation6 + $0x1], 0  ;;  %s583_s19 = smov 0   ;;  %s585_s20 = smov 0  }
  0x10   :  { %s587_s21 = smov 0   ;;  %s589_s22 = smov 0  }
  0x11   :  { %s591_s23 = smov 0   ;;  %s593_s24 = smov 0  }
  0x12 LB: > { %s336_s0 = sadd.s32 4294967295, %s547_s24   ;;  %s337_s25 = sadd.s32 4294967294, %s547_s24   ;;  %s547_s24 = sphi %s593_s24, %s22_s24   ;;  %s543_s23 = sphi %s591_s23, %s794_s23   ;;  %s539_s22 = sphi %s589_s22, %s793_s22   ;;  %s535_s21 = sphi %s587_s21, %s792_s21   ;;  %s531_s20 = sphi %s585_s20, %s791_s20   ;;  %s527_s19 = sphi %s583_s19, %s790_s19  }
  0x13   : > { %s34_s26 = sadd.s32 1, %s543_s23  ;;  %s43_s27 = sadd.s32 1, %s535_s21 }
  0x14   : > { %p36_p3 = scmp.ge.s32.totalorder %s34_s26, 2  ;;  %p50_p4 = scmp.ne.s32.totalorder %s535_s21, %s531_s20 }
  0x15   : > { %p51_p5 = scmp.eq.s32.totalorder %s547_s24, 0  ;;  %p56_p6 = scmp.ne.s32.totalorder %s531_s20, %s527_s19 }
  0x16   : > { %s796_s26 = smov (%p36_p3, %s34_s26), 0  ;;  %p57_p8 = scmp.eq.s32.totalorder %s336_s0, 0 }
  0x17   : > { %p624_p7 = por %p51_p5, %p50_p4  ;;  %s38_s29 = ssub.s32 %s543_s23, %s796_s26 }
  0x18   : > { %p82_p9 = scmp.eq.s32.totalorder %s336_s0, 1  ;;  %p41_p10 = scmp.eq.s32.totalorder %s38_s29, 0 }
  0x19   : > { %p630_p11 = por %p57_p8, %p56_p6  ;;  %p88_p13 = scmp.eq.s32.totalorder %s337_s25, 1 }
  0x1a   : > { %p634_p12 = por %p82_p9, %p50_p4  ;;  %p368_p2 = scmp.lt.s32.totalorder %s547_s24, 2 }
  0x1b   : > { %s639_s4 = scalar_select %p41_p10, %s535_s21, %s43_s27  }
  0x1c   : > { %s783_s3 = scalar_select %p634_p12, 1, 0 }
  0x1d   : > { %p641_p0 = por %p88_p13, %p56_p6  ;;  %s108_s6 = sand.u32 1, %s535_s21  }
  0x1e   : > { %s340_s7 = sshll.u32 %s108_s6, 4  ;;  %s353_s8 = sshll.u32 %s543_s23, 8 }
  0x1f   : > { %s784_s5 = scalar_select %p641_p0, 1, 0 }
  0x20   : > { %s652_s11 = scalar_lea.hbm %s778_s1, %s353_s8  ;;  %s112_s12 = scalar_lea.vmem [#allocation4], %s340_s7 }
  0x21   : > { %s121_s13 = sshll.u32 %s112_s12, 4  ;;  %p658_p3 = pnand %p368_p2, %p624_p7  ;;  %s654_s13 = int_to_ptr.vmem [resolvable:$true] %s121_s13 }
  0x22   : > { %s663_s15 = scalar_lea.sflag [#allocation5], %s108_s6  ;;  %s433_s16 = scalar_lea.hbm %s652_s11, 256 }
  0x23   : > { %p434_p5 = scmp.ne.s32.totalorder %s652_s11, %s433_s16  ;;  %p435_p6 = pneg %p658_p3 }
  0x24   : > { %s438_s0 = scalar_lea.hbm %s778_s1, 512  ;;  %p439_p7 = scmp.lt.u32.totalorder %s652_s11, %s778_s1 }
  0x25   : > { %p436_p8 = pnand %p435_p6, %p434_p5  ;;  %p440_p10 = scmp.lt.u32.totalorder %s438_s0, %s433_s16 }
  0x26   : > { %p442_p2 = scmp.lt.u32.totalorder %s433_s16, %s652_s11 }
  0x27   : > { %p437_p9 = pneg %p436_p8  ;;  %p441_p13 = por %p440_p10, %p439_p7 }
  0x29   : > { %p443_p1 = por %p442_p2, %p441_p13 }
  0x2b   : > { %p444_p4 = pnand %p443_p1, %p437_p9 }
  0x2d   : > { %447 = shalt.err (!%p444_p4)
}
  0x2e   : > { %s448_s28 = scalar_lea.vmem %s654_s13, 256  ;;  %s550_s29 = smov [#allocation4]  }
  0x2f   : > { %p449_p5 = scmp.ne.s32.totalorder %s654_s13, %s448_s28  ;;  %s453_s6 = sshll.u32 %s550_s29, 4  ;;  %s454_s6 = int_to_ptr.vmem [resolvable:$false] %s453_s6 }
  0x30   : > { %s455_s7 = scalar_lea.vmem %s454_s6, 512  ;;  %p456_p12 = scmp.lt.s32.totalorder %s654_s13, %s454_s6 }
  0x31   : > { %p451_p8 = pnand %p449_p5, %p435_p6  ;;  %p457_p7 = scmp.lt.s32.totalorder %s455_s7, %s448_s28 }
  0x33   : > { %p452_p0 = pneg %p451_p8  ;;  %p458_p10 = por %p457_p7, %p456_p12 }
  0x35   : > { %p459_p13 = pnand %p458_p10, %p452_p0 }
  0x37   : > { %462 = shalt.err (!%p459_p13)
}
  0x38   : > { %s551_s8 = smov 128   ;;  %s552_s9 = smov 8  }
  0x39   : > { %363 = dma.hbm_to_vmem [thread:$0]  (!%p658_p3), %s652_s11, 256, %s654_s13, %s663_s15, %s551_s8, %s551_s8, %s552_s9  }
  0x3a   : > { %p129_p1 = scmp.lt.s32.totalorder %s547_s24, 3  ;;  %p786_p4 = scmp.ge.s32.totalorder %s547_s24, 1 }
  0x3c   : > { %p130_p6 = pnand %p786_p4, %p129_p1 }
  0x3d   : > { %s695_s10 = sand.u32 (!%p130_p6), 1, %s531_s20  }
  0x3e   : > { %133 = sbr.rel (%p130_p6) target bundleno = 107 (0x6b), region = 24  ;;  %s344_s12 = sshll.u32 (!%p130_p6), %s695_s10, 4 }
  0x3f   : > { %s136_s16 = scalar_lea.sflag (!%p130_p6), [#allocation5], %s695_s10  ;;  %s699_s17 = scalar_lea.vmem (!%p130_p6), [#allocation4], %s344_s12 }
  0x45   : > { %518 = dma.done.wait (%p630_p11), %s136_s16, 256  }
  0x46   : > { %520 = vsyncadd (%p630_p11), %s136_s16, 4294967040  ;;  %v162_v0 = vlaneseq  ;;  %s706_s11 = sshll.u32 %s539_s22, 7  ;;  %s354_s30 = smul.u32 48, %s695_s10  ;;  %v160_v14 = vld [vmem:[%s699_s17] sm:$0xff]  ;;  %v161_v15 = vld [vmem:[%s699_s17 + $0x8] sm:$0xff] }
  0x47   : > { %s175_s13 = sld [smem:[#allocation3 + %s706_s11]]  ;;  %s176_s14 = sadd.s32 1, %s706_s11 }
  0x48   : > { %v163_v1 = vand.u32 127, %v162_v0  ;;  %v166_v2 = vshrl.u32 %v162_v0, 7  ;;  %s177_s15 = sld [smem:[#allocation3 + %s176_s14]]  ;;  %s178_s18 = sadd.s32 2, %s706_s11 }
  0x49   : > { %s179_s0 = sld [smem:[#allocation3 + %s178_s18]]  ;;  %s180_s25 = sadd.s32 3, %s706_s11 }
  0x4a   : > { %v164_v3 = vcvt.s32.f32 %v163_v1  ;;  %v167_v4 = vadd.s32 8, %v166_v2  ;;  %v172_v5 = vcvt.s32.f32 %v166_v2  ;;  %s182_s27 = sadd.s32 4, %s706_s11  ;;  %s181_s28 = sld [smem:[#allocation3 + %s180_s25]] }
  0x4b   : > { %s183_s29 = sld [smem:[#allocation3 + %s182_s27]]  ;;  %s184_s6 = sadd.s32 5, %s706_s11 }
  0x4c   : > { %v173_v6 = vcvt.s32.f32 %v167_v4  ;;  %s186_s7 = sadd.s32 6, %s706_s11  ;;  %s185_s8 = sld [smem:[#allocation3 + %s184_s6]] }
  0x4d   : > { %v192_v7 = vstv %s175_s13  ;;  %s187_s9 = sld [smem:[#allocation3 + %s186_s7]]  ;;  %s188_s12 = sadd.s32 7, %s706_s11 }
  0x4e   : > { %v193_v8 = vmul.f32 %v192_v7, %v164_v3  ;;  %v196_v9 = vstv %s177_s15  ;;  %s190_s16 = sadd.s32 8, %s706_s11  ;;  %s189_s14 = sld [smem:[#allocation3 + %s188_s12]] }
  0x4f   : > { %v197_v10 = vmul.f32 %v196_v9, %v172_v5  ;;  %v198_v11 = vmul.f32 %v196_v9, %v173_v6  ;;  %v194_v12 = vstv %s179_s0  ;;  %s191_s18 = sld [smem:[#allocation3 + %s190_s16]]  ;;  %s157_s11 = scalar_lea.vmem [#allocation7], %s354_s30 }
  0x50   : > { %v195_v13 = vadd.f32 %v194_v12, %v193_v8  ;;  %v205_v16 = vstv %s181_s28  ;;  %s249_s17 = sshll.u32 %s157_s11, 4  ;;  %s355_s13 = smul.u32 768, %s539_s22  ;;  %s723_s17 = int_to_ptr.vmem [resolvable:$true] %s249_s17 }
  0x51   : > { %v209_v17 = vstv %s183_s29  ;;  %v206_v20 = vmul.f32 %v205_v16, %v164_v3  ;;  %s234_s22 = scalar_lea.sflag [#allocation6], %s695_s10  ;;  %s463_s25 = scalar_lea.vmem %s723_s17, 768 }
  0x52   : > { %v199_v18 = vadd.f32 %v197_v10, %v195_v13  ;;  %v200_v19 = vadd.f32 %v198_v11, %v195_v13  ;;  %v210_v21 = vmul.f32 %v209_v17, %v172_v5  ;;  %v207_v22 = vstv %s185_s8  ;;  %s728_s0 = scalar_lea.hbm %s779_s2, %s355_s13  ;;  %p464_p11 = scmp.ne.s32.totalorder %s723_s17, %s463_s25 }
  0x53   : > { %v211_v23 = vmul.f32 %v209_v17, %v173_v6  ;;  %v219_v24 = vstv %s187_s9  ;;  %v208_v27 = vadd.f32 %v207_v22, %v206_v20  ;;  %p787_p12 = scmp.ne.s32.totalorder %s783_s3, 0  ;;  %s553_s27 = smov [#allocation7]  }
  0x54   : > { %v201_v25 = vmul.f32 %v199_v18, %v160_v14  ;;  %v202_v26 = vmul.f32 %v200_v19, %v161_v15  ;;  %v220_v28 = vmul.f32 %v219_v24, %v164_v3  ;;  %v223_v30 = vstv %s189_s14  ;;  %s467_s28 = sshll.u32 %s553_s27, 4  ;;  %s468_s28 = int_to_ptr.vmem [resolvable:$false] %s467_s28 }
  0x55   : > { %v221_v29 = vstv %s191_s18  ;;  %v212_v31 = vadd.f32 %v210_v21, %v208_v27  ;;  %v213_v32 = vadd.f32 %v211_v23, %v208_v27  ;;  %v224_v34 = vmul.f32 %v223_v30, %v172_v5  ;;  %p465_p0 = pnand %p464_p11, %p787_p12  ;;  %s469_s29 = scalar_lea.vmem %s468_s28, 1536 }
  0x56   : > { %203 = vst [vmem:[%s157_s11] sm:$0xff] %v201_v25  ;;  %204 = vst [vmem:[%s157_s11 + $0x8] sm:$0xff] %v202_v26  ;;  %v222_v33 = vadd.f32 %v221_v29, %v220_v28  ;;  %v225_v35 = vmul.f32 %v223_v30, %v173_v6  ;;  %p470_p9 = scmp.lt.s32.totalorder %s723_s17, %s468_s28  ;;  %p471_p2 = scmp.lt.s32.totalorder %s469_s29, %s463_s25 }
  0x57   : > { %v214_v36 = vmul.f32 %v212_v31, %v160_v14  ;;  %v215_v37 = vmul.f32 %v213_v32, %v161_v15  ;;  %p466_p3 = pneg %p465_p0 }
  0x58   : > { %v226_v38 = vadd.f32 %v224_v34, %v222_v33  ;;  %v227_v39 = vadd.f32 %v225_v35, %v222_v33  ;;  %p472_p5 = por %p471_p2, %p470_p9 }
  0x59   : > { %346 = vst [vmem:[%s157_s11 + $0x10] sm:$0xff] %v214_v36  ;;  %347 = vst [vmem:[%s157_s11 + $0x18] sm:$0xff] %v215_v37 }
  0x5a   : > { %v228_v40 = vmul.f32 %v226_v38, %v160_v14  ;;  %v229_v41 = vmul.f32 %v227_v39, %v161_v15  ;;  %p473_p8 = pnand %p472_p5, %p466_p3 }
  0x5c   : > { %348 = vst [vmem:[%s157_s11 + $0x20] sm:$0xff] %v228_v40  ;;  %349 = vst [vmem:[%s157_s11 + $0x28] sm:$0xff] %v229_v41 }
  0x5d   : > { %476 = shalt.err (!%p473_p8)
}
  0x5e   : > { %s477_s6 = scalar_lea.hbm %s728_s0, 768  ;;  %s481_s9 = scalar_lea.hbm %s779_s2, 1536 }
  0x5f   : > { %p478_p7 = scmp.ne.s32.totalorder %s728_s0, %s477_s6  ;;  %p482_p1 = scmp.lt.u32.totalorder %s728_s0, %s779_s2 }
  0x60   : > { %p483_p4 = scmp.lt.u32.totalorder %s481_s9, %s477_s6  ;;  %p485_p11 = scmp.lt.u32.totalorder %s477_s6, %s728_s0 }
  0x61   : > { %p479_p10 = pnand %p478_p7, %p787_p12 }
  0x62   : > { %p484_p6 = por %p483_p4, %p482_p1 }
  0x63   : > { %p480_p13 = pneg %p479_p10 }
  0x64   : > { %p486_p0 = por %p485_p11, %p484_p6 }
  0x66   : > { %p487_p3 = pnand %p486_p0, %p480_p13 }
  0x68   : > { %490 = shalt.err (!%p487_p3)
}
  0x69   : > { %s554_s14 = smov 128   ;;  %s555_s18 = smov 8  }
  0x6a   : > { %358 = dma.vmem_to_hbm [thread:$0]  (%p787_p12), %s723_s17, 768, %s728_s0, %s234_s22, %s554_s14, %s554_s14, %s555_s18  }
  0x6b PF: > { %s264_s11 = sand.u32 1, %s527_s19   ;;  %p788_p9 = scmp.ne.s32.totalorder %s784_s5, 0 }
  0x6c   : > { %p789_p2 = scmp.ge.s32.totalorder %s547_s24, 2  ;;  %s265_s13 = scalar_lea.sflag [#allocation6], %s264_s11 }
  0x6e   : > { %p365_p5 = pnand %p789_p2, %p788_p9 }
  0x70   : > { %522 = dma.done.wait (!%p365_p5), %s265_s13, 768  }
  0x71   : > { %524 = vsyncadd (!%p365_p5), %s265_s13, 4294966528  ;;  %s22_s24 = sadd.s32 1, %s547_s24   ;;  %s790_s19 = smov %s531_s20 }
  0x72   : > { %p19_p8 = scmp.ge.s32.totalorder %s22_s24, 4   ;;  %s791_s20 = smov %s535_s21 }
  0x73   : > { %s792_s21 = smov %s639_s4  ;;  %s793_s22 = smov %s543_s23 }
  0x74   : > { %s794_s23 = smov %s796_s26  ;;  %21 = sbr.rel (!%p19_p8) target bundleno = 18 (0x12), region = 71 }
  0x7b   :  { %270 = vsyncpa [#allocation5], 1 }
  0x7c   :  { %272 = vsyncpa [#allocation5 + $0x1], 1 }
  0x7d   :  { %273 = vsyncpa [#allocation6], 1 }
  0x7e   :  { %275 = vsyncpa [#allocation6 + $0x1], 1 }

</bundles_post_ra>
